<compile_context>
chip_gen: v7x
topology: tpu7x:2x2x1
jax: 0.10.0
libtpu: 0.0.40
codegen_flags: <defaults>
</compile_context>

<pallas_src>
import functools
import math

import jax
import jax.numpy as jnp
from jax.experimental import pallas as pl
from jax.experimental.pallas import tpu as pltpu


def _round_up(x, m):
    return ((x + m - 1) // m) * m


def _gated_attn_kernel(x_ref, wab_ref, bab_ref, wc_ref, bc_ref, A_ref, *, D):
    x = x_ref[...]                                           # (tm, L) compute dtype

    # Fused attention_a | attention_b projection: one MXU pass over (L, 2D),
    # f32 accumulation, f32 bias add.
    s = jnp.dot(x, wab_ref[...], preferred_element_type=jnp.float32)
    s = s + bab_ref[...]                                     # (tm, 2D) f32

    a = jnp.tanh(s[:, :D])                                   # (tm, D)  EUP
    b = jax.nn.sigmoid(s[:, D:])                             # (tm, D)  EUP
    ab = (a * b).astype(wc_ref.dtype)                        # gate on VPU, back to bf16

    # attention_c: Linear(D, n_classes), f32 accumulation + f32 bias.
    A = jnp.dot(ab, wc_ref[...], preferred_element_type=jnp.float32) + bc_ref[...]
    A_ref[...] = A.astype(A_ref.dtype)


def attn_net_gated(x, wa, ba, wb, bb, wc, bc, *, tm=1024,
                   compute_dtype=jnp.bfloat16, vmem_limit_bytes=None):
    """Gated attention net (Attn_Net_Gated forward, dropout=False).

    Args:
      x:  (N, L) float32 features.
      wa, ba: attention_a Linear(L, D) params in PyTorch layout (D, L), (D,).
      wb, bb: attention_b Linear(L, D) params, (D, L), (D,).
      wc, bc: attention_c Linear(D, n_classes) params, (n_classes, D), (n_classes,).
      tm: row tile (multiple of 8; 1024+ recommended for real N — clamped to
          round_up(N, 128) automatically).  On v7x keep cdiv(N, tm) >= 2 so
          both TensorCores get work; on v5e/v7x size tm to the VMEM budget.
      compute_dtype: matmul input dtype (default bf16; f32 accumulation and
          f32 biases/output always).  Use jnp.float32 for exact semantics.
      vmem_limit_bytes: optional scoped-VMEM override for very large tiles.

    Returns:
      (A: (N, n_classes) float32, x: (N, L))  — x is the original array,
      passed through untouched (no redundant HBM round-trip).
    """
    N, L = x.shape
    D = wa.shape[0]
    n_classes = wc.shape[0]

    # --- One-time, grid-invariant prep (outside the hot loop) -------------
    # Fuse + pre-transpose the two D-wide projections: (L, 2D) weight, (1, 2D)
    # bias, so the kernel does a single (tm, L) @ (L, 2D) pass.
    wab_t = jnp.concatenate([wa.T, wb.T], axis=1).astype(compute_dtype)   # (L, 2D)
    bab = jnp.concatenate([ba, bb]).reshape(1, 2 * D).astype(jnp.float32)
    wc_t = wc.T.astype(compute_dtype)                                     # (D, n_classes)
    bc2 = bc.reshape(1, n_classes).astype(jnp.float32)

    # Dominant HBM stream in compute dtype (bf16 halves the bytes).
    x_c = x.astype(compute_dtype)

    # Row tile: multiple of 8, no bigger than needed for small N.
    tm = max(8, min(_round_up(int(tm), 8), _round_up(N, 128)))
    n_tiles = pl.cdiv(N, tm)          # ragged N handled by Pallas OOB masking

    full = lambda i: (0, 0)
    kernel = functools.partial(_gated_attn_kernel, D=D)

    A = pl.pallas_call(
        kernel,
        out_shape=jax.ShapeDtypeStruct((N, n_classes), jnp.float32),
        grid_spec=pltpu.PrefetchScalarGridSpec(
            num_scalar_prefetch=0,
            grid=(n_tiles,),
            in_specs=[
                pl.BlockSpec((tm, L), lambda i: (i, 0)),   # x tile (dominant traffic)
                pl.BlockSpec((L, 2 * D), full),            # [Wa^T | Wb^T]  (resident)
                pl.BlockSpec((1, 2 * D), full),            # [ba | bb]      (f32)
                pl.BlockSpec((D, n_classes), full),        # Wc^T
                pl.BlockSpec((1, n_classes), full),        # bc             (f32)
            ],
            out_specs=pl.BlockSpec((tm, n_classes), lambda i: (i, 0)),
        ),
        compiler_params=pltpu.CompilerParams(
            dimension_semantics=("parallel",),             # shards rows over 2 TCs on v7x
            vmem_limit_bytes=vmem_limit_bytes),
    )(x_c, wab_t, bab, wc_t, bc2)

    return A, x


def _init_linear(key, out_features, in_features):
    """Deterministic init mimicking nn.Linear defaults."""
    kw, kb = jax.random.split(key)
    bound = 1.0 / math.sqrt(in_features)
    w = jax.random.uniform(kw, (out_features, in_features),
                           minval=-bound, maxval=bound, dtype=jnp.float32)
    b = jax.random.uniform(kb, (out_features,),
                           minval=-bound, maxval=bound, dtype=jnp.float32)
    return w, b


if __name__ == "__main__":
    # Small, lane-aligned demo shapes (real model: L=1024, D=256, n_classes=1).
    # N is deliberately NOT a multiple of tm to exercise the ragged/OOB-masked
    # last block, and > tm so the grid has several steps.
    N, L, D, n_classes = 300, 256, 128, 1
    tm = 128

    key = jax.random.PRNGKey(0)
    kx, ka, kb, kc = jax.random.split(key, 4)

    x = jax.random.normal(kx, (N, L), dtype=jnp.float32)
    wa, ba = _init_linear(ka, D, L)          # attention_a Linear(L, D)
    wb, bb = _init_linear(kb, D, L)          # attention_b Linear(L, D)
    wc, bc = _init_linear(kc, n_classes, D)  # attention_c Linear(D, n_classes)

    A, x_out = attn_net_gated(x, wa, ba, wb, bb, wc, bc, tm=tm)
    jax.block_until_ready((A, x_out))
    assert A.shape == (N, n_classes) and x_out.shape == (N, L)

    # Reference 1: same bf16 casts as the kernel (tight check of structure,
    # fusion, and ragged-N handling).
    xb = x.astype(jnp.bfloat16)
    wab = jnp.concatenate([wa.T, wb.T], axis=1).astype(jnp.bfloat16)
    s = jnp.dot(xb, wab, preferred_element_type=jnp.float32) \
        + jnp.concatenate([ba, bb])[None, :]
    a_r = jnp.tanh(s[:, :D])
    b_r = jax.nn.sigmoid(s[:, D:])
    A_ref_bf16 = jnp.dot((a_r * b_r).astype(jnp.bfloat16),
                         wc.T.astype(jnp.bfloat16),
                         preferred_element_type=jnp.float32) + bc[None, :]
    assert jnp.allclose(A, A_ref_bf16, atol=2e-3, rtol=2e-3)

    # Reference 2: exact f32 PyTorch semantics (loose tolerance — the bf16
    # compute path intentionally deviates slightly from pure f32).
    a_f = jnp.tanh(x @ wa.T + ba)
    b_f = jax.nn.sigmoid(x @ wb.T + bb)
    A_ref_f32 = (a_f * b_f) @ wc.T + bc
    assert jnp.allclose(A, A_ref_f32, atol=5e-2, rtol=5e-2)

    assert jnp.allclose(x_out, x)

    print("KERNEL_OK")
</pallas_src>

<mosaic_0001>
module attributes {stable_mosaic.version = 11 : i64} {
  func.func @_gated_attn_kernel(%arg0: i32, %arg1: memref<128x256xbf16, #tpu.memory_space<vmem>>, %arg2: memref<256x256xbf16, #tpu.memory_space<vmem>>, %arg3: memref<1x256xf32, #tpu.memory_space<vmem>>, %arg4: memref<128x1xbf16, #tpu.memory_space<vmem>>, %arg5: memref<1x1xf32, #tpu.memory_space<vmem>>, %arg6: memref<128x1xf32, #tpu.memory_space<vmem>>) attributes {dimension_semantics = [#tpu.dimension_semantics<parallel>], iteration_bounds = array<i64: 3>, scalar_prefetch = 0 : i64, scratch_operands = 0 : i64, tpu.core_type = #tpu.core_type<tc>, window_params = [{transform_indices = @transform_0, window_bounds = array<i64: 128, 256>}, {pipeline_mode = #tpu.pipeline_mode<synchronous>, transform_indices = @transform_1, window_bounds = array<i64: 256, 256>}, {pipeline_mode = #tpu.pipeline_mode<synchronous>, transform_indices = @transform_2, window_bounds = array<i64: 1, 256>}, {pipeline_mode = #tpu.pipeline_mode<synchronous>, transform_indices = @transform_3, window_bounds = array<i64: 128, 1>}, {pipeline_mode = #tpu.pipeline_mode<synchronous>, transform_indices = @transform_4, window_bounds = array<i64: 1, 1>}, {transform_indices = @transform_5, window_bounds = array<i64: 128, 1>}]} {
    %c0 = arith.constant 0 : index
    %c0_0 = arith.constant 0 : index
    %0 = vector.load %arg1[%c0, %c0_0] : memref<128x256xbf16, #tpu.memory_space<vmem>>, vector<128x256xbf16>
    %c0_1 = arith.constant 0 : index
    %c0_2 = arith.constant 0 : index
    %1 = vector.load %arg2[%c0_1, %c0_2] : memref<256x256xbf16, #tpu.memory_space<vmem>>, vector<256x256xbf16>
    %cst = arith.constant dense<0.000000e+00> : vector<128x256xf32>
    %2 = tpu.matmul %0, %1, %cst {dimension_numbers = #tpu.dot_dimension_numbers<[1], [0], [0], [1], [0, 0, 1, 1], [], []>} : vector<128x256xbf16>, vector<256x256xbf16>, vector<128x256xf32> -> vector<128x256xf32>
    %c0_3 = arith.constant 0 : index
    %c0_4 = arith.constant 0 : index
    %3 = vector.load %arg3[%c0_3, %c0_4] : memref<1x256xf32, #tpu.memory_space<vmem>>, vector<1x256xf32>
    %4 = vector.broadcast %3 : vector<1x256xf32> to vector<128x256xf32>
    %5 = arith.addf %2, %4 : vector<128x256xf32>
    %6 = vector.extract_strided_slice %5 {offsets = [0, 0], sizes = [128, 128], strides = [1, 1]} : vector<128x256xf32> to vector<128x128xf32>
    %7 = math.tanh %6 : vector<128x128xf32>
    %8 = vector.extract_strided_slice %5 {offsets = [0, 128], sizes = [128, 128], strides = [1, 1]} : vector<128x256xf32> to vector<128x128xf32>
    %9 = arith.negf %8 : vector<128x128xf32>
    %10 = math.exp %9 : vector<128x128xf32>
    %cst_5 = arith.constant 1.000000e+00 : f32
    %11 = vector.broadcast %cst_5 : f32 to vector<128x128xf32>
    %12 = arith.addf %11, %10 : vector<128x128xf32>
    %13 = arith.divf %11, %12 : vector<128x128xf32>
    %14 = arith.mulf %7, %13 : vector<128x128xf32>
    %15 = arith.truncf %14 : vector<128x128xf32> to vector<128x128xbf16>
    %c0_6 = arith.constant 0 : index
    %c0_7 = arith.constant 0 : index
    %16 = vector.load %arg4[%c0_6, %c0_7] : memref<128x1xbf16, #tpu.memory_space<vmem>>, vector<128x1xbf16>
    %cst_8 = arith.constant dense<0.000000e+00> : vector<128x1xf32>
    %17 = tpu.matmul %15, %16, %cst_8 {dimension_numbers = #tpu.dot_dimension_numbers<[1], [0], [0], [1], [0, 0, 1, 1], [], []>} : vector<128x128xbf16>, vector<128x1xbf16>, vector<128x1xf32> -> vector<128x1xf32>
    %c0_9 = arith.constant 0 : index
    %c0_10 = arith.constant 0 : index
    %18 = vector.load %arg5[%c0_9, %c0_10] : memref<1x1xf32, #tpu.memory_space<vmem>>, vector<1x1xf32>
    %19 = vector.broadcast %18 : vector<1x1xf32> to vector<128x1xf32>
    %20 = arith.addf %17, %19 : vector<128x1xf32>
    %c0_11 = arith.constant 0 : index
    %c0_12 = arith.constant 0 : index
    %21 = vector.load %arg6[%c0_11, %c0_12] : memref<128x1xf32, #tpu.memory_space<vmem>>, vector<128x1xf32>
    tpu.vector_store %arg6[%c0_11, %c0_12], %20 {strides = array<i32>} : memref<128x1xf32, #tpu.memory_space<vmem>>, vector<128x1xf32>,
    return
  }
  func.func @transform_0(%arg0: i32) -> (i32, i32) {
    %c0_i32 = arith.constant 0 : i32
    %c0_i32_0 = arith.constant 0 : i32
    return %arg0, %c0_i32 : i32, i32
  }
  func.func @transform_1(%arg0: i32) -> (i32, i32) {
    %c0_i32 = arith.constant 0 : i32
    %c0_i32_0 = arith.constant 0 : i32
    %c0_i32_1 = arith.constant 0 : i32
    return %c0_i32, %c0_i32_0 : i32, i32
  }
  func.func @transform_2(%arg0: i32) -> (i32, i32) {
    %c0_i32 = arith.constant 0 : i32
    %c0_i32_0 = arith.constant 0 : i32
    %c0_i32_1 = arith.constant 0 : i32
    return %c0_i32, %c0_i32_0 : i32, i32
  }
  func.func @transform_3(%arg0: i32) -> (i32, i32) {
    %c0_i32 = arith.constant 0 : i32
    %c0_i32_0 = arith.constant 0 : i32
    %c0_i32_1 = arith.constant 0 : i32
    return %c0_i32, %c0_i32_0 : i32, i32
  }
  func.func @transform_4(%arg0: i32) -> (i32, i32) {
    %c0_i32 = arith.constant 0 : i32
    %c0_i32_0 = arith.constant 0 : i32
    %c0_i32_1 = arith.constant 0 : i32
    return %c0_i32, %c0_i32_0 : i32, i32
  }
  func.func @transform_5(%arg0: i32) -> (i32, i32) {
    %c0_i32 = arith.constant 0 : i32
    %c0_i32_0 = arith.constant 0 : i32
    return %arg0, %c0_i32 : i32, i32
  }
}

</mosaic_0001>

<bundles_post_ra>
// kernel: tpu_custom_call.1
= control target key start
LH: loop header
LB: loop body
LE: loop exit
PB: predicated region body
PF: predicated region fallthrough
CT: control target
= control target key end

     0   :  { %s2312_s0 = inlined_call_operand.hbm [shape: bf16[300,256], index: 0, kind: input, shape index: {}]   ;;  %s2313_s1 = inlined_call_operand.hbm [shape: bf16[256,256], index: 1, kind: input, shape index: {}]   ;;  %s2314_s2 = inlined_call_operand.vmem [shape: f32[1,256], index: 2, kind: input, shape index: {}]   ;;  %s2315_s3 = inlined_call_operand.vmem [shape: bf16[128,1], index: 3, kind: input, shape index: {}]   ;;  %s2316_s4 = inlined_call_operand.<no memory space> [shape: f32[1,1], index: 4, kind: input, shape index: {}]   ;;  %s2317_s5 = inlined_call_operand.vmem [shape: f32[300,1], index: 5, kind: output, shape index: {}]  }
   0x1   :  { %v10_v0 = vstv %s2316_s4 }
   0x2   :  { %11 = vst [vmem:[#allocation2] sm:$0x1] %v10_v0 }
   0x3   :  { %12 = vsyncpa [#allocation4], 0 }
   0x4   :  { %14 = vsyncpa [#allocation4 + $0x1], 0 }
   0x5   :  { %15 = vsyncpa [#allocation6], 0  ;;  %s1954_s20 = smov 0   ;;  %s1956_s21 = smov 0  }
   0x6   :  { %s1958_s22 = smov 0   ;;  %s1960_s23 = smov 0  }
   0x7 LB: > { %s1973_s4 = sadd.s32 4294967295, %s1881_s23   ;;  %s1976_s24 = sadd.s32 1, %s1881_s23   ;;  %s1881_s23 = sphi %s1960_s23, %s2338_s23   ;;  %s1877_s22 = sphi %s1958_s22, %s2337_s22   ;;  %s1873_s21 = sphi %s1956_s21, %s2336_s21   ;;  %s1869_s20 = sphi %s1954_s20, %s2335_s20  }
   0x8   : > { %s25_s25 = ssub.s32 %s1881_s23, %s1976_s24  ;;  %s28_s26 = sadd.s32 1, %s1877_s22 }
   0x9   : > { %p26_p0 = scmp.eq.s32.totalorder %s25_s25, 0  ;;  %p35_p1 = scmp.ne.s32.totalorder %s1877_s22, %s1873_s21 }
   0xa   : > { %p36_p2 = scmp.eq.s32.totalorder %s1881_s23, 0  ;;  %p41_p3 = scmp.ne.s32.totalorder %s1873_s21, %s1869_s20 }
   0xb   : > { %s1986_s27 = scalar_select %p26_p0, %s1877_s22, %s28_s26  }
   0xc   : > { %p1988_p4 = por %p36_p2, %p35_p1  ;;  %p2318_p5 = scmp.eq.s32.totalorder %s1973_s4, 0 }
   0xd   : > { %p149_p6 = scmp.eq.s32.totalorder %s1973_s4, 2  ;;  %p1307_p7 = scmp.ge.s32.totalorder %s1881_s23, 1 }
   0xe   : > { %s2321_s28 = scalar_select %p1988_p4, 1, 0 }
   0xf   : > { %p1997_p8 = por %p2318_p5, %p41_p3  ;;  %p162_p9 = scmp.lt.s32.totalorder %s1881_s23, 4 }
  0x10   : > { %p2002_p10 = por %p149_p6, %p35_p1  ;;  %s1915_s7 = smov [#allocation5]  }
  0x11   : > { %s2322_s29 = scalar_select %p1997_p8, 1, 0 }
  0x12   : > { %s2323_s30 = scalar_select %p2002_p10, 1, 0 }
  0x13   : > { %p2006_p11 = pnand %p1307_p7, %p162_p9  ;;  %s174_s8 = sshll.u32 %s1915_s7, 4  ;;  %s175_s8 = int_to_ptr.vmem [resolvable:$true] %s174_s8 }
  0x14   : > { %s1755_s12 = scalar_lea.hbm %s2313_s1, 4096 }
  0x15   : > { %s2324_s6 = scalar_select %p2006_p11, 1, 0 }
  0x16   : > { %p1472_p12 = pneg %p2006_p11  ;;  %p1756_p0 = scmp.ne.s32.totalorder %s2313_s1, %s1755_s12 }
  0x17   : > { %p1762_p6 = scmp.lt.u32.totalorder %s1755_s12, %s2313_s1 }
  0x18   : > { %p2014_p13 = pnand %p1472_p12, %p2318_p5 }
  0x1a   : > { %p1757_p1 = pneg %p2014_p13 }
  0x1c   : > { %p1758_p2 = pnand %p1757_p1, %p1756_p0 }
  0x1e   : > { %p1759_p3 = pneg %p1758_p2 }
  0x20   : > { %p1764_p7 = pnand %p1762_p6, %p1759_p3 }
  0x22   : > { %1767 = shalt.err (!%p1764_p7)
}
  0x23   : > { %s1768_s17 = scalar_lea.vmem %s175_s8, 4096  ;;  %p1776_p10 = scmp.lt.s32.totalorder %s175_s8, %s175_s8 }
  0x24   : > { %p1769_p9 = scmp.ne.s32.totalorder %s175_s8, %s1768_s17  ;;  %p1777_p8 = scmp.lt.s32.totalorder %s1768_s17, %s1768_s17 }
  0x26   : > { %p1771_p12 = pnand %p1769_p9, %p1757_p1  ;;  %p1778_p11 = por %p1777_p8, %p1776_p10 }
  0x28   : > { %p1772_p5 = pneg %p1771_p12 }
  0x2a   : > { %p1779_p4 = pnand %p1778_p11, %p1772_p5 }
  0x2c   : > { %1782 = shalt.err (!%p1779_p4)
}
  0x2d   : > { %s1916_s18 = smov 128   ;;  %s1917_s19 = smov 8  }
  0x2e   : > { %1475 = dma.hbm_to_vmem [thread:$0]  (!%p2014_p13), %s2313_s1, 4096, %s175_s8, [#allocation6], %s1916_s18, %s1916_s18, %s1917_s19  }
  0x2f   : > { %p1309_p0 = scmp.ge.s32.totalorder %s1881_s23, 3 }
  0x30   : > { %p2326_p2 = scmp.ne.s32.totalorder (!%p1309_p0), %s2321_s28, 0 }
  0x31   : > { %193 = sbr.rel (%p1309_p0) target bundleno = 91 (0x5b), region = 32 }
  0x38   : > { %196 = sbr.rel (!%p2326_p2) target bundleno = 91 (0x5b), region = 36  ;;  %s197_s26 = sand.u32 (%p2326_p2), 1, %s1877_s22  }
  0x39   : > { %s1311_s7 = sshll.u32 (%p2326_p2), %s1881_s23, 4  ;;  %s1310_s10 = sshll.u32 (%p2326_p2), %s197_s26, 7 }
  0x3a   : > { %s203_s11 = ssub.s32 (%p2326_p2), 38, %s1311_s7  ;;  %s2042_s13 = scalar_lea.sflag (%p2326_p2), [#allocation4], %s197_s26 }
  0x3b   : > { %p204_p4 = scmp.lt.s32.totalorder (%p2326_p2), %s203_s11, 16  ;;  %s201_s8 = scalar_lea.vmem (%p2326_p2), [#allocation3], %s1310_s10 }
  0x3f   : > { %s2340_s11 = smov (!%p204_p4, %s203_s11), 16 }
  0x40   : > { %s2039_s12 = sshll.u32 %s2340_s11, 7 }
  0x41   : > { %s209_s9 = ssub.s32 2048, %s2039_s12 }
  0x42   : > { %210 = vsyncadd %s2042_s13, %s209_s9  ;;  %p1314_p5 = scmp.ne.s32.totalorder %s2039_s12, 0  ;;  %s1415_s28 = sshll.u32 %s1881_s23, 11 }
  0x43   : > { %s2050_s16 = scalar_lea.hbm %s2312_s0, %s1415_s28  ;;  %s216_s17 = sshll.u32 %s201_s8, 4  ;;  %s2052_s17 = int_to_ptr.vmem [resolvable:$true] %s216_s17 }
  0x44   : > { %s1783_s18 = scalar_lea.hbm %s2050_s16, %s2039_s12  ;;  %s1787_s23 = scalar_lea.hbm %s2312_s0, 4864 }
  0x45   : > { %p1784_p8 = scmp.ne.s32.totalorder %s2050_s16, %s1783_s18  ;;  %p1788_p13 = scmp.lt.u32.totalorder %s2050_s16, %s2312_s0 }
  0x46   : > { %p1789_p1 = scmp.lt.u32.totalorder %s1787_s23, %s1783_s18  ;;  %p1791_p6 = scmp.lt.u32.totalorder %s1783_s18, %s2050_s16 }
  0x47   : > { %p1785_p10 = pnand %p1784_p8, %p1314_p5 }
  0x48   : > { %p1790_p3 = por %p1789_p1, %p1788_p13 }
  0x49   : > { %p1786_p11 = pneg %p1785_p10 }
  0x4a   : > { %p1792_p7 = por %p1791_p6, %p1790_p3 }
  0x4c   : > { %p1793_p9 = pnand %p1792_p7, %p1786_p11 }
  0x4e   : > { %1796 = shalt.err (!%p1793_p9)
}
  0x4f   : > { %s1797_s7 = scalar_lea.vmem %s2052_s17, %s2039_s12  ;;  %s1918_s10 = smov [#allocation3]  }
  0x50   : > { %p1798_p12 = scmp.ne.s32.totalorder %s2052_s17, %s1797_s7  ;;  %s1801_s11 = sshll.u32 %s1918_s10, 4  ;;  %s1802_s11 = int_to_ptr.vmem [resolvable:$false] %s1801_s11 }
  0x51   : > { %s1803_s9 = scalar_lea.vmem %s1802_s11, 4096  ;;  %p1804_p4 = scmp.lt.s32.totalorder %s2052_s17, %s1802_s11 }
  0x52   : > { %p1799_p0 = pnand %p1798_p12, %p1314_p5  ;;  %p1805_p8 = scmp.lt.s32.totalorder %s1803_s9, %s1797_s7 }
  0x54   : > { %p1800_p2 = pneg %p1799_p0  ;;  %p1806_p10 = por %p1805_p8, %p1804_p4 }
  0x56   : > { %p1807_p13 = pnand %p1806_p10, %p1800_p2 }
  0x58   : > { %1810 = shalt.err (!%p1807_p13)
}
  0x59   : > { %s1919_s8 = smov 128   ;;  %s1920_s28 = smov 8  }
  0x5a   : > { %222 = dma.hbm_to_vmem [thread:$0]  (%p1314_p5), %s2050_s16, %s2039_s12, %s2052_s17, %s2042_s13, %s1919_s8, %s1919_s8, %s1920_s28  }
  0x5b PF: > { %p2327_p11 = scmp.ne.s32.totalorder %s2324_s6, 0 }
  0x5c   : > { %s230_s14 = sand.u32 (!%p2327_p11), 1, %s1873_s21   ;;  %p2328_p1 = scmp.ne.s32.totalorder (!%p2327_p11), %s2322_s29, 0 }
  0x5d   : > { %228 = sbr.rel (%p2327_p11) target bundleno = 739 (0x2e3), region = 40  ;;  %s2082_s15 = sshll.u32 (!%p2327_p11), %s230_s14, 7 }
  0x5e   : > { %s231_s18 = scalar_lea.sflag (!%p2327_p11), [#allocation4], %s230_s14  ;;  %s2085_s19 = scalar_lea.vmem (!%p2327_p11), [#allocation3], %s2082_s15 }
  0x64   : > { %1860 = dma.done.wait (%p2328_p1), %s231_s18, 2048  }
  0x65   : > { %1862 = vsyncadd (%p2328_p1), %s231_s18, 4294965248  ;;  %p2329_p5 = scmp.eq.s32.totalorder %s1973_s4, 0 }
  0x67   : > { %1864 = dma.done.wait (%p2329_p5), [#allocation6], 4096   ;;  %p2330_p3 = pmov %p2329_p5 }
  0x68   : > { %v1579_v1 = vld [vmem:[#allocation5 + $0x4] ss:$8 sps:$4 sm:$0xff]   ;;  %v1581_v2 = vld [vmem:[#allocation5] ss:$8 sps:$4 sm:$0xff]   ;;  %v1582_v3 = vld [vmem:[#allocation5 + $0x14] ss:$8 sps:$4 sm:$0xff]   ;;  %v326_v57 = vlaneseq }
  0x69   : > { %1866 = vsyncadd (%p2330_p3), [#allocation6], 4294963200  ;;  %576 = vmatprep.subr.bf16.mxu0 %v1579_v1  ;;  %v1584_v4 = vld [vmem:[#allocation5 + $0x10] ss:$8 sps:$4 sm:$0xff]   ;;  %v1585_v5 = vld [vmem:[#allocation5 + $0x24] ss:$8 sps:$4 sm:$0xff]  }
  0x6a   : > { %577 = vmatpush1.bf16.msra.mxu0 %v1581_v2  ;;  %v1587_v6 = vld [vmem:[#allocation5 + $0x20] ss:$8 sps:$4 sm:$0xff]   ;;  %v1588_v7 = vld [vmem:[#allocation5 + $0x34] ss:$8 sps:$4 sm:$0xff]   ;;  %v1590_v8 = vld [vmem:[#allocation5 + $0x30] ss:$8 sps:$4 sm:$0xff]  }
  0x6b   : > { %578 = vmatprep.subr.bf16.mxu0 %v1582_v3  ;;  %v1591_v9 = vld [vmem:[#allocation5 + $0x44] ss:$8 sps:$4 sm:$0xff]   ;;  %v1593_v10 = vld [vmem:[#allocation5 + $0x40] ss:$8 sps:$4 sm:$0xff]   ;;  %v1594_v11 = vld [vmem:[#allocation5 + $0x54] ss:$8 sps:$4 sm:$0xff]  }
  0x6c   : > { %v1596_v12 = vld [vmem:[#allocation5 + $0x50] ss:$8 sps:$4 sm:$0xff]   ;;  %v1597_v13 = vld [vmem:[#allocation5 + $0x64] ss:$8 sps:$4 sm:$0xff]   ;;  %v1599_v15 = vld [vmem:[#allocation5 + $0x60] ss:$8 sps:$4 sm:$0xff]  }
  0x6d   : > { %v1629_v14 = vld [vmem:[%s2085_s19 + $0x4] ss:$8 sps:$4 sm:$0xff]   ;;  %v1600_v16 = vld [vmem:[#allocation5 + $0x74] ss:$8 sps:$4 sm:$0xff]   ;;  %v1602_v17 = vld [vmem:[#allocation5 + $0x70] ss:$8 sps:$4 sm:$0xff]  }
  0x6e   : > { %579 = vmatpush1.bf16.msra.mxu0 %v1584_v4  ;;  %608 = vmatprep.mubr.bf16.mxu0 %v1629_v14  ;;  %v1603_v18 = vld [vmem:[#allocation5 + $0x84] ss:$8 sps:$4 sm:$0xff]   ;;  %v1605_v19 = vld [vmem:[#allocation5 + $0x80] ss:$8 sps:$4 sm:$0xff]   ;;  %v1606_v20 = vld [vmem:[#allocation5 + $0x94] ss:$8 sps:$4 sm:$0xff]  }
  0x6f   : > { %580 = vmatprep.subr.bf16.mxu0 %v1585_v5  ;;  %v1608_v21 = vld [vmem:[#allocation5 + $0x90] ss:$8 sps:$4 sm:$0xff]   ;;  %v1609_v22 = vld [vmem:[#allocation5 + $0xa4] ss:$8 sps:$4 sm:$0xff]   ;;  %v1611_v23 = vld [vmem:[#allocation5 + $0xa0] ss:$8 sps:$4 sm:$0xff]  }
  0x70   : > { %v1612_v24 = vld [vmem:[#allocation5 + $0xb4] ss:$8 sps:$4 sm:$0xff]   ;;  %v1614_v25 = vld [vmem:[#allocation5 + $0xb0] ss:$8 sps:$4 sm:$0xff]   ;;  %v1615_v26 = vld [vmem:[#allocation5 + $0xc4] ss:$8 sps:$4 sm:$0xff]  }
  0x71   : > { %v1617_v27 = vld [vmem:[#allocation5 + $0xc0] ss:$8 sps:$4 sm:$0xff]   ;;  %v1618_v28 = vld [vmem:[#allocation5 + $0xd4] ss:$8 sps:$4 sm:$0xff]   ;;  %v1620_v29 = vld [vmem:[#allocation5 + $0xd0] ss:$8 sps:$4 sm:$0xff]  }
  0x72   : > { %581 = vmatpush1.bf16.msra.mxu0 %v1587_v6  ;;  %v1621_v30 = vld [vmem:[#allocation5 + $0xe4] ss:$8 sps:$4 sm:$0xff]   ;;  %v1623_v31 = vld [vmem:[#allocation5 + $0xe0] ss:$8 sps:$4 sm:$0xff]   ;;  %v1624_v32 = vld [vmem:[#allocation5 + $0xf4] ss:$8 sps:$4 sm:$0xff]  }
  0x73   : > { %582 = vmatprep.subr.bf16.mxu0 %v1588_v7  ;;  %v1626_v33 = vld [vmem:[#allocation5 + $0xf0] ss:$8 sps:$4 sm:$0xff]   ;;  %v1627_v34 = vld [vmem:[%s2085_s19] ss:$8 sps:$4 sm:$0xff]   ;;  %v1630_v35 = vld [vmem:[%s2085_s19 + $0x14] ss:$8 sps:$4 sm:$0xff]  }
  0x74   : > { %v1632_v36 = vld [vmem:[%s2085_s19 + $0x10] ss:$8 sps:$4 sm:$0xff]   ;;  %v1633_v37 = vld [vmem:[%s2085_s19 + $0x24] ss:$8 sps:$4 sm:$0xff]   ;;  %v1635_v38 = vld [vmem:[%s2085_s19 + $0x20] ss:$8 sps:$4 sm:$0xff]  }
  0x75   : > { %v1636_v39 = vld [vmem:[%s2085_s19 + $0x34] ss:$8 sps:$4 sm:$0xff]   ;;  %v1638_v40 = vld [vmem:[%s2085_s19 + $0x30] ss:$8 sps:$4 sm:$0xff]   ;;  %v1639_v41 = vld [vmem:[%s2085_s19 + $0x44] ss:$8 sps:$4 sm:$0xff]  }
  0x76   : > { %583 = vmatpush1.bf16.msra.mxu0 %v1590_v8  ;;  %v1641_v42 = vld [vmem:[%s2085_s19 + $0x40] ss:$8 sps:$4 sm:$0xff]   ;;  %v1642_v43 = vld [vmem:[%s2085_s19 + $0x54] ss:$8 sps:$4 sm:$0xff]   ;;  %v1644_v44 = vld [vmem:[%s2085_s19 + $0x50] ss:$8 sps:$4 sm:$0xff]  }
  0x77   : > { %584 = vmatprep.subr.bf16.mxu0 %v1591_v9  ;;  %v1645_v45 = vld [vmem:[%s2085_s19 + $0x64] ss:$8 sps:$4 sm:$0xff]   ;;  %v1647_v46 = vld [vmem:[%s2085_s19 + $0x60] ss:$8 sps:$4 sm:$0xff]   ;;  %v1648_v47 = vld [vmem:[%s2085_s19 + $0x74] ss:$8 sps:$4 sm:$0xff]  }
  0x78   : > { %v1650_v48 = vld [vmem:[%s2085_s19 + $0x70] ss:$8 sps:$4 sm:$0xff]   ;;  %v1651_v49 = vld [vmem:[%s2315_s3] sm:$0xff]   ;;  %v1652_v50 = vld [vmem:[%s2315_s3 + $0x8] sm:$0xff]   ;;  %v327_v58 = vshrl.u32 %v326_v57, 7  ;;  %vm993_vm0 = vcmask 7168  }
  0x79   : > { %1435 = vmatprep.subr.bf16.mxu1 %v1651_v49  ;;  %v1653_v51 = vld [vmem:[%s2315_s3 + $0x10] sm:$0xff]   ;;  %v1654_v52 = vld [vmem:[%s2315_s3 + $0x18] sm:$0xff]   ;;  %v1655_v53 = vld [vmem:[%s2315_s3 + $0x20] sm:$0xff]   ;;  %s2175_s19 = scalar_lea.vmem [#allocation7], %s2082_s15   ;;  %p2331_p6 = scmp.ne.s32.totalorder %s2323_s30, 0 }
  0x7a   : > { %585 = vmatpush1.bf16.msra.mxu0 %v1593_v10  ;;  %1436 = vmatpush3.bf16.msra.mxu1 %v1651_v49  ;;  %v1656_v54 = vld [vmem:[%s2315_s3 + $0x28] sm:$0xff]   ;;  %v1657_v55 = vld [vmem:[%s2315_s3 + $0x30] sm:$0xff]   ;;  %v1658_v56 = vld [vmem:[%s2315_s3 + $0x38] sm:$0xff]   ;;  %v332_v59 = vsub.s32 1, %v327_v58  ;;  %v328_v5 = vsub.s32 0, %v327_v58  ;;  %s1397_s15 = sshll.u32 (%p2331_p6), %s1973_s4, 4 }
  0x7b   : > { %586 = vmatprep.subr.bf16.mxu0 %v1594_v11  ;;  %1437 = vmatprep.subr.bf16.mxu1 %v1652_v50  ;;  %v324_v60 = vld [vmem:[%s2314_s2] sm:$0x3]  ;;  %s1416_s29 = sshll.u32 (%p2331_p6), %s1973_s4, 7  ;;  %s1018_s6 = ssub.s32 (%p2331_p6), 38, %s1397_s15 }
  0x7c   : > { %v2138_v61 = vrot.slane %v324_v60, %v332_v59  ;;  %v2142_v9 = vrot.slane %v324_v60, %v328_v5  ;;  %s2216_s16 = scalar_lea.vmem (%p2331_p6), %s2317_s5, %s1416_s29   ;;  %p1019_p7 = scmp.lt.s32.totalorder (%p2331_p6), %s1018_s6, 16 }
  0x7e   : > { %587 = vmatpush1.bf16.msra.mxu0 %v1596_v12  ;;  %1438 = vmatpush3.bf16.msra.mxu1 %v1652_v50 }
  0x7f   : > { %588 = vmatprep.subr.bf16.mxu0 %v1597_v13  ;;  %1439 = vmatprep.subr.bf16.mxu1 %v1653_v51 }
  0x82   : > { %589 = vmatpush1.bf16.msra.mxu0 %v1599_v15  ;;  %1440 = vmatpush3.bf16.msra.mxu1 %v1653_v51 }
  0x83   : > { %590 = vmatprep.subr.bf16.mxu0 %v1600_v16  ;;  %1441 = vmatprep.subr.bf16.mxu1 %v1654_v52 }
  0x86   : > { %591 = vmatpush1.bf16.msra.mxu0 %v1602_v17  ;;  %1442 = vmatpush3.bf16.msra.mxu1 %v1654_v52 }
  0x87   : > { %592 = vmatprep.subr.bf16.mxu0 %v1603_v18  ;;  %1443 = vmatprep.subr.bf16.mxu1 %v1655_v53 }
  0x8a   : > { %593 = vmatpush1.bf16.msra.mxu0 %v1605_v19  ;;  %1444 = vmatpush3.bf16.msra.mxu1 %v1655_v53 }
  0x8b   : > { %594 = vmatprep.subr.bf16.mxu0 %v1606_v20  ;;  %1445 = vmatprep.subr.bf16.mxu1 %v1656_v54 }
  0x8e   : > { %595 = vmatpush1.bf16.msra.mxu0 %v1608_v21  ;;  %1446 = vmatpush3.bf16.msra.mxu1 %v1656_v54 }
  0x8f   : > { %596 = vmatprep.subr.bf16.mxu0 %v1609_v22  ;;  %1447 = vmatprep.subr.bf16.mxu1 %v1657_v55 }
  0x92   : > { %597 = vmatpush1.bf16.msra.mxu0 %v1611_v23  ;;  %1448 = vmatpush3.bf16.msra.mxu1 %v1657_v55 }
  0x93   : > { %598 = vmatprep.subr.bf16.mxu0 %v1612_v24  ;;  %1449 = vmatprep.subr.bf16.mxu1 %v1658_v56 }
  0x96   : > { %599 = vmatpush1.bf16.msra.mxu0 %v1614_v25  ;;  %1450 = vmatpush3.bf16.msra.mxu1 %v1658_v56 }
  0x97   : > { %600 = vmatprep.subr.bf16.mxu0 %v1615_v26 }
  0x9a   : > { %601 = vmatpush1.bf16.msra.mxu0 %v1617_v27 }
  0x9b   : > { %602 = vmatprep.subr.bf16.mxu0 %v1618_v28 }
  0x9e   : > { %603 = vmatpush1.bf16.msra.mxu0 %v1620_v29 }
  0x9f   : > { %604 = vmatprep.subr.bf16.mxu0 %v1621_v30 }
  0xa2   : > { %605 = vmatpush1.bf16.msra.mxu0 %v1623_v31 }
  0xa3   : > { %606 = vmatprep.subr.bf16.mxu0 %v1624_v32 }
  0xa6   : > { %607 = vmatpush1.bf16.msra.mxu0 %v1626_v33 }
  0xa9   : > { %609 = vmatmul.mubr.bf16.vlgmr.msra.gmra.mrb[0].mxu0 %v1627_v34 }
  0xaa   : > { %618 = vmatprep.mubr.bf16.mxu0 %v1630_v35 }
  0xb1   : > { %619 = vmatmul.mubr.bf16.gmra.mrb[4].mxu0 %v1632_v36 }
  0xb2   : > { %628 = vmatprep.mubr.bf16.mxu0 %v1633_v37 }
  0xb9   : > { %629 = vmatmul.mubr.bf16.gmra.mrb[8].mxu0 %v1635_v38 }
  0xba   : > { %638 = vmatprep.mubr.bf16.mxu0 %v1636_v39 }
  0xc1   : > { %639 = vmatmul.mubr.bf16.gmra.mrb[12].mxu0 %v1638_v40 }
  0xc2   : > { %648 = vmatprep.mubr.bf16.mxu0 %v1639_v41 }
  0xc9   : > { %649 = vmatmul.mubr.bf16.gmra.mrb[16].mxu0 %v1641_v42 }
  0xca   : > { %658 = vmatprep.mubr.bf16.mxu0 %v1642_v43 }
  0xd1   : > { %659 = vmatmul.mubr.bf16.gmra.mrb[20].mxu0 %v1644_v44 }
  0xd2   : > { %668 = vmatprep.mubr.bf16.mxu0 %v1645_v45 }
  0xd9   : > { %669 = vmatmul.mubr.bf16.gmra.mrb[24].mxu0 %v1647_v46 }
  0xda   : > { %678 = vmatprep.mubr.bf16.mxu0 %v1648_v47 }
  0xe1   : > { %679 = vmatmul.mubr.bf16.gmra.mrb[28].mxu0 %v1650_v48 }
 0x17c   : > { %v610_v62 = vpop.f32.mrb[0].mxu0 }
 0x17d   : > { %v612_v63 = vpop.f32.mrb[1].mxu0  ;;  %v611_v15 = vadd.f32 %v610_v62, %v2142_v9 }
 0x17e   : > { %v613_v0 = vadd.f32 %v612_v63, %v2138_v61  ;;  %v614_v1 = vpop.f32.mrb[2].mxu0 }
 0x17f   : > { %v616_v2 = vpop.f32.mrb[3].mxu0  ;;  %v615_v18 = vadd.f32 %v614_v1, %v2142_v9 }
 0x180   : > { %v1371_v3 = vmul.f32 -1.442695, %v613_v0  ;;  %v617_v4 = vadd.f32 %v616_v2, %v2138_v61 }
 0x182   : > { %1659 = vpow2.f32 %v1371_v3  ;;  %v1372_v6 = vmul.f32 -1.442695, %v617_v4 }
 0x184   : > { %1661 = vpow2.f32 %v1372_v6  ;;  %v620_v7 = vpop.f32.mrb[4].mxu0 }
 0x185   : > { %v622_v8 = vpop.f32.mrb[5].mxu0  ;;  %v621_v29 = vadd.f32 %v620_v7, %v2142_v9 }
 0x186   : > { %v623_v10 = vadd.f32 %v622_v8, %v2138_v61  ;;  %v624_v11 = vpop.f32.mrb[6].mxu0 }
 0x187   : > { %v626_v12 = vpop.f32.mrb[7].mxu0  ;;  %v625_v32 = vadd.f32 %v624_v11, %v2142_v9 }
 0x188   : > { %v1373_v13 = vmul.f32 -1.442695, %v623_v10  ;;  %v627_v14 = vadd.f32 %v626_v12, %v2138_v61 }
 0x18a   : > { %1663 = vpow2.f32 %v1373_v13  ;;  %v1374_v16 = vmul.f32 -1.442695, %v627_v14 }
 0x18c   : > { %v1660_v17 = vpop.eup %1659  ;;  %1665 = vpow2.f32 %v1374_v16  ;;  %v630_v19 = vpop.f32.mrb[8].mxu0 }
 0x18d   : > { %v753_v20 = vadd.f32 1.0, %v1660_v17  ;;  %v632_v21 = vpop.f32.mrb[9].mxu0  ;;  %1667 = vtanh.f32 %v611_v15  ;;  %v631_v46 = vadd.f32 %v630_v19, %v2142_v9 }
 0x18e   : > { %v1662_v22 = vpop.eup %1661  ;;  %v633_v23 = vadd.f32 %v632_v21, %v2138_v61  ;;  %v634_v24 = vpop.f32.mrb[10].mxu0 }
 0x18f   : > { %1669 = vrcp.f32 %v753_v20  ;;  %v754_v25 = vadd.f32 1.0, %v1662_v22  ;;  %v636_v26 = vpop.f32.mrb[11].mxu0  ;;  %v635_v51 = vadd.f32 %v634_v24, %v2142_v9 }
 0x190   : > { %1671 = vtanh.f32 %v615_v18  ;;  %v1375_v27 = vmul.f32 -1.442695, %v633_v23  ;;  %v637_v28 = vadd.f32 %v636_v26, %v2138_v61 }
 0x191   : > { %1673 = vrcp.f32 %v754_v25 }
 0x192   : > { %1675 = vpow2.f32 %v1375_v27  ;;  %v1376_v30 = vmul.f32 -1.442695, %v637_v28 }
 0x194   : > { %v1664_v31 = vpop.eup %1663  ;;  %1677 = vpow2.f32 %v1376_v30  ;;  %v640_v33 = vpop.f32.mrb[12].mxu0 }
 0x195   : > { %v755_v34 = vadd.f32 1.0, %v1664_v31  ;;  %v642_v35 = vpop.f32.mrb[13].mxu0  ;;  %1679 = vtanh.f32 %v621_v29  ;;  %v641_v4 = vadd.f32 %v640_v33, %v2142_v9 }
 0x196   : > { %v1666_v36 = vpop.eup %1665  ;;  %v643_v37 = vadd.f32 %v642_v35, %v2138_v61  ;;  %v644_v38 = vpop.f32.mrb[14].mxu0 }
 0x197   : > { %1681 = vrcp.f32 %v755_v34  ;;  %v756_v39 = vadd.f32 1.0, %v1666_v36  ;;  %v646_v40 = vpop.f32.mrb[15].mxu0  ;;  %v1668_v41 = vpop.eup %1667  ;;  %v645_v10 = vadd.f32 %v644_v38, %v2142_v9 }
 0x198   : > { %1683 = vtanh.f32 %v625_v32  ;;  %v1377_v42 = vmul.f32 -1.442695, %v643_v37  ;;  %v647_v43 = vadd.f32 %v646_v40, %v2138_v61 }
 0x199   : > { %v1670_v44 = vpop.eup %1669  ;;  %1685 = vrcp.f32 %v756_v39 }
 0x19a   : > { %v1672_v45 = vpop.eup %1671  ;;  %1687 = vpow2.f32 %v1377_v42  ;;  %v1378_v47 = vmul.f32 -1.442695, %v647_v43  ;;  %v801_v48 = vmul.f32 %v1670_v44, %v1668_v41 }
 0x19b   : > { %v1674_v49 = vpop.eup %1673 }
 0x19c   : > { %v1676_v50 = vpop.eup %1675  ;;  %1689 = vpow2.f32 %v1378_v47  ;;  %v650_v52 = vpop.f32.mrb[16].mxu0  ;;  %v802_v53 = vmul.f32 %v1674_v49, %v1672_v45 }
 0x19d   : > { %v757_v54 = vadd.f32 1.0, %v1676_v50  ;;  %v652_v55 = vpop.f32.mrb[17].mxu0  ;;  %1691 = vtanh.f32 %v631_v46  ;;  %v651_v26 = vadd.f32 %v650_v52, %v2142_v9 }
 0x19e   : > { %v1678_v56 = vpop.eup %1677  ;;  %v653_v57 = vadd.f32 %v652_v55, %v2138_v61  ;;  %v654_v58 = vpop.f32.mrb[18].mxu0  ;;  %v817_v59 = vpack.c.bf16 %v802_v53, %v801_v48 }
 0x19f   : > { %1693 = vrcp.f32 %v757_v54  ;;  %v758_v60 = vadd.f32 1.0, %v1678_v56  ;;  %v656_v62 = vpop.f32.mrb[19].mxu0  ;;  %v1680_v63 = vpop.eup %1679  ;;  %v655_v31 = vadd.f32 %v654_v58, %v2142_v9 }
 0x1a0   : > { %1695 = vtanh.f32 %v635_v51  ;;  %v1379_v0 = vmul.f32 -1.442695, %v653_v57  ;;  %v657_v1 = vadd.f32 %v656_v62, %v2138_v61  ;;  %1451 = vmatprep.mubr.bf16.mxu1 %v817_v59 }
 0x1a1   : > { %v1682_v2 = vpop.eup %1681  ;;  %1697 = vrcp.f32 %v758_v60 }
 0x1a2   : > { %v1684_v3 = vpop.eup %1683  ;;  %1699 = vpow2.f32 %v1379_v0  ;;  %v1380_v5 = vmul.f32 -1.442695, %v657_v1  ;;  %v803_v6 = vmul.f32 %v1682_v2, %v1680_v63 }
 0x1a3   : > { %v1686_v7 = vpop.eup %1685 }
 0x1a4   : > { %v1688_v8 = vpop.eup %1687  ;;  %1701 = vpow2.f32 %v1380_v5  ;;  %v660_v11 = vpop.f32.mrb[20].mxu0  ;;  %v804_v12 = vmul.f32 %v1686_v7, %v1684_v3 }
 0x1a5   : > { %v759_v13 = vadd.f32 1.0, %v1688_v8  ;;  %v662_v14 = vpop.f32.mrb[21].mxu0  ;;  %1703 = vtanh.f32 %v641_v4  ;;  %v661_v47 = vadd.f32 %v660_v11, %v2142_v9 }
 0x1a6   : > { %v1690_v15 = vpop.eup %1689  ;;  %v663_v16 = vadd.f32 %v662_v14, %v2138_v61  ;;  %v664_v17 = vpop.f32.mrb[22].mxu0  ;;  %v818_v18 = vpack.c.bf16 %v804_v12, %v803_v6 }
 0x1a7   : > { %1705 = vrcp.f32 %v759_v13  ;;  %v760_v19 = vadd.f32 1.0, %v1690_v15  ;;  %v666_v20 = vpop.f32.mrb[23].mxu0  ;;  %v1692_v21 = vpop.eup %1691  ;;  %v665_v52 = vadd.f32 %v664_v17, %v2142_v9 }
 0x1a8   : > { %1707 = vtanh.f32 %v645_v10  ;;  %v1381_v22 = vmul.f32 -1.442695, %v663_v16  ;;  %v667_v23 = vadd.f32 %v666_v20, %v2138_v61  ;;  %1452 = vmatmul.mubr.bf16.vlgmr.msra.gmra.mrb[0].mxu1 %v818_v18 }
 0x1a9   : > { %v1694_v24 = vpop.eup %1693  ;;  %1709 = vrcp.f32 %v760_v19 }
 0x1aa   : > { %v1696_v25 = vpop.eup %1695  ;;  %1711 = vpow2.f32 %v1381_v22  ;;  %v1382_v27 = vmul.f32 -1.442695, %v667_v23  ;;  %v805_v28 = vmul.f32 %v1694_v24, %v1692_v21 }
 0x1ab   : > { %v1698_v29 = vpop.eup %1697 }
 0x1ac   : > { %v1700_v30 = vpop.eup %1699  ;;  %1713 = vpow2.f32 %v1382_v27  ;;  %v670_v32 = vpop.f32.mrb[24].mxu0  ;;  %v806_v33 = vmul.f32 %v1698_v29, %v1696_v25 }
 0x1ad   : > { %v761_v34 = vadd.f32 1.0, %v1700_v30  ;;  %v672_v35 = vpop.f32.mrb[25].mxu0  ;;  %1715 = vtanh.f32 %v651_v26  ;;  %v671_v5 = vadd.f32 %v670_v32, %v2142_v9 }
 0x1ae   : > { %v1702_v36 = vpop.eup %1701  ;;  %v673_v37 = vadd.f32 %v672_v35, %v2138_v61  ;;  %v674_v38 = vpop.f32.mrb[26].mxu0  ;;  %v819_v39 = vpack.c.bf16 %v806_v33, %v805_v28 }
 0x1af   : > { %1717 = vrcp.f32 %v761_v34  ;;  %v762_v40 = vadd.f32 1.0, %v1702_v36  ;;  %v676_v41 = vpop.f32.mrb[27].mxu0  ;;  %v1704_v42 = vpop.eup %1703  ;;  %v675_v11 = vadd.f32 %v674_v38, %v2142_v9 }
 0x1b0   : > { %1719 = vtanh.f32 %v655_v31  ;;  %v1383_v43 = vmul.f32 -1.442695, %v673_v37  ;;  %v677_v44 = vadd.f32 %v676_v41, %v2138_v61  ;;  %1455 = vmatprep.mubr.bf16.mxu1 %v819_v39 }
 0x1b1   : > { %v1706_v45 = vpop.eup %1705  ;;  %1721 = vrcp.f32 %v762_v40 }
 0x1b2   : > { %v1708_v46 = vpop.eup %1707  ;;  %1723 = vpow2.f32 %v1383_v43  ;;  %v1384_v48 = vmul.f32 -1.442695, %v677_v44  ;;  %v807_v49 = vmul.f32 %v1706_v45, %v1704_v42  ;;  %v1387_v42 = vld [vmem:[#allocation2] ss:$0 sm:$0xff] }
 0x1b3   : > { %v1710_v50 = vpop.eup %1709 }
 0x1b4   : > { %v1712_v51 = vpop.eup %1711  ;;  %1725 = vpow2.f32 %v1384_v48  ;;  %v680_v53 = vpop.f32.mrb[28].mxu0  ;;  %v808_v54 = vmul.f32 %v1710_v50, %v1708_v46 }
 0x1b5   : > { %v763_v55 = vadd.f32 1.0, %v1712_v51  ;;  %v682_v56 = vpop.f32.mrb[29].mxu0  ;;  %1727 = vtanh.f32 %v661_v47  ;;  %v681_v19 = vadd.f32 %v680_v53, %v2142_v9 }
 0x1b6   : > { %v1714_v57 = vpop.eup %1713  ;;  %v683_v58 = vadd.f32 %v682_v56, %v2138_v61  ;;  %v684_v59 = vpop.f32.mrb[30].mxu0  ;;  %v820_v60 = vpack.c.bf16 %v808_v54, %v807_v49 }
 0x1b7   : > { %1729 = vrcp.f32 %v763_v55  ;;  %v764_v62 = vadd.f32 1.0, %v1714_v57  ;;  %v686_v63 = vpop.f32.mrb[31].mxu0  ;;  %v1716_v0 = vpop.eup %1715  ;;  %v685_v23 = vadd.f32 %v684_v59, %v2142_v9 }
 0x1b8   : > { %1731 = vtanh.f32 %v665_v52  ;;  %v1385_v1 = vmul.f32 -1.442695, %v683_v58  ;;  %v687_v2 = vadd.f32 %v686_v63, %v2138_v61  ;;  %1456 = vmatmul.mubr.bf16.gmra.mrb[4].mxu1 %v820_v60 }
 0x1b9   : > { %v1718_v3 = vpop.eup %1717  ;;  %1733 = vrcp.f32 %v764_v62 }
 0x1ba   : > { %v1720_v4 = vpop.eup %1719  ;;  %1735 = vpow2.f32 %v1385_v1  ;;  %v1386_v6 = vmul.f32 -1.442695, %v687_v2  ;;  %v809_v7 = vmul.f32 %v1718_v3, %v1716_v0 }
 0x1bb   : > { %v1722_v8 = vpop.eup %1721 }
 0x1bc   : > { %v1724_v10 = vpop.eup %1723  ;;  %1737 = vpow2.f32 %v1386_v6  ;;  %v810_v12 = vmul.f32 %v1722_v8, %v1720_v4 }
 0x1bd   : > { %v765_v13 = vadd.f32 1.0, %v1724_v10  ;;  %1739 = vtanh.f32 %v671_v5 }
 0x1be   : > { %v1726_v14 = vpop.eup %1725  ;;  %v821_v15 = vpack.c.bf16 %v810_v12, %v809_v7 }
 0x1bf   : > { %1741 = vrcp.f32 %v765_v13  ;;  %v766_v61 = vadd.f32 1.0, %v1726_v14  ;;  %v1728_v16 = vpop.eup %1727 }
 0x1c0   : > { %1743 = vtanh.f32 %v675_v11  ;;  %1459 = vmatprep.mubr.bf16.mxu1 %v821_v15 }
 0x1c1   : > { %v1730_v17 = vpop.eup %1729  ;;  %1745 = vrcp.f32 %v766_v61 }
 0x1c2   : > { %v1732_v18 = vpop.eup %1731  ;;  %v811_v20 = vmul.f32 %v1730_v17, %v1728_v16  ;;  %1747 = vtanh.f32 %v681_v19 }
 0x1c3   : > { %v1734_v21 = vpop.eup %1733 }
 0x1c4   : > { %v1736_v22 = vpop.eup %1735  ;;  %v812_v24 = vmul.f32 %v1734_v21, %v1732_v18 }
 0x1c5   : > { %v767_v25 = vadd.f32 1.0, %v1736_v22 }
 0x1c6   : > { %v1738_v26 = vpop.eup %1737  ;;  %v822_v27 = vpack.c.bf16 %v812_v24, %v811_v20 }
 0x1c7   : > { %1749 = vrcp.f32 %v767_v25  ;;  %v768_v28 = vadd.f32 1.0, %v1738_v26  ;;  %v1740_v29 = vpop.eup %1739 }
 0x1c8   : > { %1751 = vtanh.f32 %v685_v23  ;;  %1460 = vmatmul.mubr.bf16.gmra.mrb[8].mxu1 %v822_v27 }
 0x1c9   : > { %v1742_v30 = vpop.eup %1741  ;;  %1753 = vrcp.f32 %v768_v28 }
 0x1ca   : > { %v1744_v31 = vpop.eup %1743  ;;  %v813_v32 = vmul.f32 %v1742_v30, %v1740_v29 }
 0x1cb   : > { %v1746_v33 = vpop.eup %1745 }
 0x1cc   : > { %v814_v34 = vmul.f32 %v1746_v33, %v1744_v31  ;;  %v1748_v36 = vpop.eup %1747 }
 0x1ce   : > { %v823_v35 = vpack.c.bf16 %v814_v34, %v813_v32 }
 0x1d0   : > { %1463 = vmatprep.mubr.bf16.mxu1 %v823_v35 }
 0x1d1   : > { %v1750_v9 = vpop.eup %1749 }
 0x1d2   : > { %v1752_v37 = vpop.eup %1751  ;;  %v815_v38 = vmul.f32 %v1750_v9, %v1748_v36 }
 0x1d3   : > { %v1754_v39 = vpop.eup %1753 }
 0x1d4   : > { %v816_v40 = vmul.f32 %v1754_v39, %v1752_v37 }
 0x1d6   : > { %v824_v41 = vpack.c.bf16 %v816_v40, %v815_v38 }
 0x1d8   : > { %1464 = vmatmul.mubr.bf16.gmra.mrb[12].mxu1 %v824_v41 }
 0x27b   : > { %v1453_v43 = vpop.f32.mrb[0].mxu1 }
 0x27c   : > { %v939_v44 = vadd.f32 %v1453_v43, %v1387_v42  ;;  %v930_v45 = vpop.f32.mrb[1].mxu1 }
 0x27d   : > { %v931_v46 = vadd.f32 %v1387_v42, %v930_v45  ;;  %v1454_v47 = vpop.f32.mrb[2].mxu1 }
 0x27e   : > { %996 = vst.msk [vmem:[%s2175_s19 + $0x10] sm:$0xff] %vm993_vm0, %v939_v44  ;;  %v942_v48 = vadd.f32 %v1454_v47, %v1387_v42  ;;  %v933_v49 = vpop.f32.mrb[3].mxu1 }
 0x27f   : > { %994 = vst.msk [vmem:[%s2175_s19] sm:$0xff] %vm993_vm0, %v931_v46  ;;  %v934_v50 = vadd.f32 %v1387_v42, %v933_v49 }
 0x280   : > { %997 = vst.msk [vmem:[%s2175_s19 + $0x18] sm:$0xff] %vm993_vm0, %v942_v48 }
 0x281   : > { %995 = vst.msk [vmem:[%s2175_s19 + $0x8] sm:$0xff] %vm993_vm0, %v934_v50 }
 0x28b   : > { %v1457_v51 = vpop.f32.mrb[4].mxu1 }
 0x28c   : > { %v955_v52 = vadd.f32 %v1457_v51, %v1387_v42  ;;  %v946_v53 = vpop.f32.mrb[5].mxu1 }
 0x28d   : > { %v947_v54 = vadd.f32 %v1387_v42, %v946_v53  ;;  %v1458_v55 = vpop.f32.mrb[6].mxu1 }
 0x28e   : > { %1000 = vst.msk [vmem:[%s2175_s19 + $0x30] sm:$0xff] %vm993_vm0, %v955_v52  ;;  %v958_v56 = vadd.f32 %v1458_v55, %v1387_v42  ;;  %v949_v57 = vpop.f32.mrb[7].mxu1 }
 0x28f   : > { %998 = vst.msk [vmem:[%s2175_s19 + $0x20] sm:$0xff] %vm993_vm0, %v947_v54  ;;  %v950_v58 = vadd.f32 %v1387_v42, %v949_v57 }
 0x290   : > { %1001 = vst.msk [vmem:[%s2175_s19 + $0x38] sm:$0xff] %vm993_vm0, %v958_v56 }
 0x291   : > { %999 = vst.msk [vmem:[%s2175_s19 + $0x28] sm:$0xff] %vm993_vm0, %v950_v58 }
 0x29b   : > { %v1461_v59 = vpop.f32.mrb[8].mxu1 }
 0x29c   : > { %v971_v60 = vadd.f32 %v1461_v59, %v1387_v42  ;;  %v962_v62 = vpop.f32.mrb[9].mxu1 }
 0x29d   : > { %v963_v63 = vadd.f32 %v1387_v42, %v962_v62  ;;  %v1462_v0 = vpop.f32.mrb[10].mxu1 }
 0x29e   : > { %1004 = vst.msk [vmem:[%s2175_s19 + $0x50] sm:$0xff] %vm993_vm0, %v971_v60  ;;  %v974_v1 = vadd.f32 %v1462_v0, %v1387_v42  ;;  %v965_v2 = vpop.f32.mrb[11].mxu1 }
 0x29f   : > { %1002 = vst.msk [vmem:[%s2175_s19 + $0x40] sm:$0xff] %vm993_vm0, %v963_v63  ;;  %v966_v3 = vadd.f32 %v1387_v42, %v965_v2 }
 0x2a0   : > { %1005 = vst.msk [vmem:[%s2175_s19 + $0x58] sm:$0xff] %vm993_vm0, %v974_v1 }
 0x2a1   : > { %1003 = vst.msk [vmem:[%s2175_s19 + $0x48] sm:$0xff] %vm993_vm0, %v966_v3 }
 0x2ab   : > { %v1465_v4 = vpop.f32.mrb[12].mxu1  ;;  %1016 = sbr.rel (!%p2331_p6) target bundleno = 739 (0x2e3), region = 52 }
 0x2ac   : > { %v987_v5 = vadd.f32 %v1465_v4, %v1387_v42  ;;  %v978_v6 = vpop.f32.mrb[13].mxu1 }
 0x2ad   : > { %v979_v7 = vadd.f32 %v1387_v42, %v978_v6  ;;  %v1466_v8 = vpop.f32.mrb[14].mxu1 }
 0x2ae   : > { %1008 = vst.msk [vmem:[%s2175_s19 + $0x70] sm:$0xff] %vm993_vm0, %v987_v5  ;;  %v990_v10 = vadd.f32 %v1466_v8, %v1387_v42  ;;  %v981_v11 = vpop.f32.mrb[15].mxu1 }
 0x2af   : > { %1006 = vst.msk [vmem:[%s2175_s19 + $0x60] sm:$0xff] %vm993_vm0, %v979_v7  ;;  %v982_v12 = vadd.f32 %v1387_v42, %v981_v11 }
 0x2b0   : > { %1009 = vst.msk [vmem:[%s2175_s19 + $0x78] sm:$0xff] %vm993_vm0, %v990_v10 }
 0x2b1   : > { %1007 = vst.msk [vmem:[%s2175_s19 + $0x68] sm:$0xff] %vm993_vm0, %v982_v12 }
 0x2b2   : > { %s2342_s6 = smov (!%p1019_p7, %s1018_s6), 16 }
 0x2b3   : > { %s1398_s17 = sshll.u32 %s2342_s6, 7 }
 0x2b4   : > { %p1401_p9 = scmp.eq.s32.totalorder %s1398_s17, 0 }
 0x2b5   : > { %s2222_s30 = sshrl.u32 (!%p1401_p9), %s2342_s6, 4 }
 0x2b6   : > { %1027 = sbr.rel (%p1401_p9) target bundleno = 739 (0x2e3), region = 56  ;;  %p1402_p12 = scmp.le.s32.totalorder (!%p1401_p9), %s2222_s30, 0 }
 0x2bd   : > { %1250 = sbr.rel (%p1402_p12) target bundleno = 718 (0x2ce), region = 138  ;;  %s2332_s4 = smov (!%p1402_p12), %s2216_s16 }
 0x2be   : > { %s2333_s20 = smov (!%p1402_p12), %s2175_s19  ;;  %s2231_s23 = smov (!%p1402_p12), 0  }
 0x2bf   : > { %s2233_s25 = smov (!%p1402_p12), 0  }
 0x2c4 LB: >> { %v1119_v13 = vld [vmem:[%s1889_s20] sm:$0xff]  ;;  %v1121_v14 = vld [vmem:[%s1889_s20 + $0x8] sm:$0xff]  ;;  %v1123_v15 = vld [vmem:[%s1889_s20 + $0x10] sm:$0xff]  ;;  %s1151_s26 = sadd.s32 1, %s1893_s23  ;;  %s1113_s25 = sadd.s32 1, %s1897_s25   ;;  %s1897_s25 = sphi %s2233_s25, %s1113_s25   ;;  %s1893_s23 = sphi %s2231_s23, %s2334_s23   ;;  %s1889_s20 = sphi %s2333_s20, %s1156_s20   ;;  %s1885_s4 = sphi %s2332_s4, %s1157_s4  }
 0x2c5   : >> { %1120 = vst [vmem:[%s1885_s4] sm:$0xff] %v1119_v13  ;;  %1122 = vst [vmem:[%s1885_s4 + $0x8] sm:$0xff] %v1121_v14  ;;  %v1125_v61 = vld [vmem:[%s1889_s20 + $0x18] sm:$0xff]  ;;  %v1127_v16 = vld [vmem:[%s1889_s20 + $0x20] sm:$0xff]  ;;  %p1152_p0 = scmp.ge.s32.totalorder %s1151_s26, %s2222_s30  ;;  %p1112_p2 = scmp.ge.s32.totalorder %s1113_s25, %s2222_s30 }
 0x2c6   : >> { %1124 = vst [vmem:[%s1885_s4 + $0x10] sm:$0xff] %v1123_v15  ;;  %v1129_v17 = vld [vmem:[%s1889_s20 + $0x28] sm:$0xff]  ;;  %1126 = vst [vmem:[%s1885_s4 + $0x18] sm:$0xff] %v1125_v61  ;;  %v1131_v18 = vld [vmem:[%s1889_s20 + $0x30] sm:$0xff] }
 0x2c7   : >> { %1128 = vst [vmem:[%s1885_s4 + $0x20] sm:$0xff] %v1127_v16  ;;  %1130 = vst [vmem:[%s1885_s4 + $0x28] sm:$0xff] %v1129_v17  ;;  %v1133_v19 = vld [vmem:[%s1889_s20 + $0x38] sm:$0xff]  ;;  %v1135_v20 = vld [vmem:[%s1889_s20 + $0x40] sm:$0xff]  ;;  %s2344_s26 = smov (%p1152_p0, %s1151_s26), 0  ;;  %1115 = sbr.rel (!%p1112_p2) target bundleno = 708 (0x2c4), region = 144 }
 0x2c8   : >> { %1132 = vst [vmem:[%s1885_s4 + $0x30] sm:$0xff] %v1131_v18  ;;  %1134 = vst [vmem:[%s1885_s4 + $0x38] sm:$0xff] %v1133_v19  ;;  %v1137_v21 = vld [vmem:[%s1889_s20 + $0x48] sm:$0xff]  ;;  %v1139_v22 = vld [vmem:[%s1889_s20 + $0x50] sm:$0xff]  ;;  %s1403_s7 = sshll.u32 %s2344_s26, 7  ;;  %s2334_s23 = smov %s2344_s26 }
 0x2c9   : >> { %1136 = vst [vmem:[%s1885_s4 + $0x40] sm:$0xff] %v1135_v20  ;;  %v1141_v23 = vld [vmem:[%s1889_s20 + $0x58] sm:$0xff]  ;;  %1138 = vst [vmem:[%s1885_s4 + $0x48] sm:$0xff] %v1137_v21  ;;  %v1143_v24 = vld [vmem:[%s1889_s20 + $0x60] sm:$0xff] }
 0x2ca   : >> { %1140 = vst [vmem:[%s1885_s4 + $0x50] sm:$0xff] %v1139_v22  ;;  %1142 = vst [vmem:[%s1885_s4 + $0x58] sm:$0xff] %v1141_v23  ;;  %v1145_v25 = vld [vmem:[%s1889_s20 + $0x68] sm:$0xff]  ;;  %v1147_v26 = vld [vmem:[%s1889_s20 + $0x70] sm:$0xff] }
 0x2cb   : >> { %1144 = vst [vmem:[%s1885_s4 + $0x60] sm:$0xff] %v1143_v24  ;;  %1146 = vst [vmem:[%s1885_s4 + $0x68] sm:$0xff] %v1145_v25  ;;  %v1149_v27 = vld [vmem:[%s1889_s20 + $0x78] sm:$0xff]  ;;  %s1156_s20 = scalar_lea.vmem %s2175_s19, %s1403_s7 [#allocation7]  }
 0x2cc   : >> { %1148 = vst [vmem:[%s1885_s4 + $0x70] sm:$0xff] %v1147_v26  ;;  %1150 = vst [vmem:[%s1885_s4 + $0x78] sm:$0xff] %v1149_v27  ;;  %s1157_s4 = scalar_lea.vmem %s2216_s16, %s1403_s7  }
 0x2ce PF: > { %s2291_s10 = sand.u32 15, %s2342_s6   ;;  %s1417_s11 = sshll.u32 %s2222_s30, 7 }
 0x2cf   : > { %s1162_s9 = scalar_lea.vmem %s2175_s19, %s1417_s11 [#allocation7]   ;;  %s1164_s8 = scalar_lea.vmem %s2216_s16, %s1417_s11  }
 0x2d0   : > { %p1408_p4 = scmp.le.s32.totalorder %s2291_s10, 0 }
 0x2d1   : > { %s1899_s28 = smov (!%p1408_p4), %s1164_s8   ;;  %s1903_s14 = smov (!%p1408_p4), %s1162_s9  }
 0x2d2   : > { %1264 = sbr.rel (%p1408_p4) target bundleno = 739 (0x2e3), region = 149  ;;  %s1907_s18 = smov (!%p1408_p4), 0  }
 0x2d3   : > { %s1911_s15 = smov (!%p1408_p4), 0  }
 0x2d9 LB: >> { %v1174_v28 = vld [vmem:[%s1905_s14] sm:$0xff]  ;;  %s1176_s29 = sadd.s32 1, %s1909_s18  ;;  %s1168_s15 = sadd.s32 1, %s1913_s15   ;;  %s1913_s15 = sphi %s1911_s15, %s1168_s15   ;;  %s1909_s18 = sphi %s1907_s18, %s1908_s18   ;;  %s1905_s14 = sphi %s1903_s14, %s1181_s14   ;;  %s1901_s28 = sphi %s1899_s28, %s1182_s28  }
 0x2da   : >> { %1175 = vst [vmem:[%s1901_s28] sm:$0xff] %v1174_v28  ;;  %p1177_p8 = scmp.ge.s32.totalorder %s1176_s29, %s2291_s10  ;;  %p1167_p10 = scmp.ge.s32.totalorder %s1168_s15, %s2291_s10 }
 0x2dc   : >> { %s2346_s29 = smov (%p1177_p8, %s1176_s29), 0  ;;  %1170 = sbr.rel (!%p1167_p10) target bundleno = 729 (0x2d9), region = 155 }
 0x2dd   : >> { %s1409_s19 = sshll.u32 %s2346_s29, 3  ;;  %s1908_s18 = smov %s2346_s29  }
 0x2de   : >> { %s1181_s14 = scalar_lea.vmem %s1162_s9, %s1409_s19 [#allocation7]   ;;  %s1182_s28 = scalar_lea.vmem %s1164_s8, %s1409_s19  }
 0x2e3 PF: > { %p18_p13 = scmp.ge.s32.totalorder %s1976_s24, 5   ;;  %s2335_s20 = smov %s1873_s21 }
 0x2e4   : > { %s2336_s21 = smov %s1877_s22  ;;  %s2337_s22 = smov %s1986_s27 }
 0x2e5   : > { %s2338_s23 = smov %s1976_s24  ;;  %20 = sbr.rel (!%p18_p13) target bundleno = 7 (0x7), region = 166 }
 0x2ec   :  { %1198 = vsyncpa [#allocation4], 1 }
 0x2ed   :  { %1200 = vsyncpa [#allocation4 + $0x1], 1 }
 0x2ee   :  { %1201 = vsyncpa [#allocation6], 1 }

</bundles_post_ra>
